<compile_context>
chip_gen: v5e
topology: v5e:2x2
jax: 0.10.0
libtpu: 0.0.40
codegen_flags: <defaults>
</compile_context>

<pallas_src>
import functools

import jax
import jax.numpy as jnp
import numpy as np
from jax.experimental import pallas as pl
from jax.experimental.pallas import tpu as pltpu


def _context_kernel(embn_ref,     # (BT, H)   current-node embedding rows (native dtype)
                    emba_ref,     # (BT, H)   current-agent embedding rows (native dtype)
                    x_ref,        # (BT, N)   node x coords (lane-major)
                    y_ref,        # (BT, N)   node y coords (lane-major)
                    vis_ref,      # (BT, N)   visited flags, int8
                    ascal_ref,    # (BT, 5)   length, speed, capacity, used, agent_idx(float)
                    w1_ref,       # (H, H)    W_ctx[:H]      (current-node projection)
                    w2_ref,       # (H, H)    W_ctx[H:2H]    (current-agent projection)
                    wsmall_ref,   # (6, H)    fused small-feature projection
                    bfused_ref,   # (1, H)    fused bias
                    out_ref,      # (BT, H)
                    *, num_agents, num_clients, demand_scaler, speed_scaler):
    # --- distance-to-depot features (lane-axis reductions) ---
    x = x_ref[...]                                        # (BT, N)
    y = y_ref[...]
    dx = x - x[:, 0:1]
    dy = y - y[:, 0:1]
    dist = jnp.sqrt(dx * dx + dy * dy)                    # (BT, N) distance to depot (node 0)

    vis = vis_ref[...].astype(jnp.float32)                # (BT, N) 0/1
    max_dist = jnp.max(dist, axis=-1, keepdims=True)                       # (BT, 1)
    remain_max_dist = jnp.max(dist * (1.0 - vis), axis=-1, keepdims=True)  # (BT, 1)

    # --- per-agent scalar features ---
    sc = ascal_ref[...]                                   # (BT, 5)
    length_a = sc[:, 0:1]
    speed_a = sc[:, 1:2]
    cap_a = sc[:, 2:3]
    used_a = sc[:, 3:4]
    aidx_f = sc[:, 4:5]

    inv_speed = speed_scaler / speed_a                    # one divide, reused 3x
    f0 = length_a * inv_speed
    f1 = (cap_a - used_a) * (1.0 / demand_scaler)
    f2 = max_dist * inv_speed
    f3 = remain_max_dist * inv_speed

    # --- global features (no iota/select: subtract the agent-node prefix sum) ---
    vis_total = jnp.sum(vis, axis=-1, keepdims=True)                       # (BT, 1)
    vis_agents = jnp.sum(vis[:, :num_agents], axis=-1, keepdims=True)      # (BT, 1)
    g0 = (vis_total - vis_agents) * (1.0 / num_clients)
    g1 = aidx_f + (1.0 / num_agents)

    small = jnp.concatenate([f0, f1, f2, f3, g0, g1], axis=-1)             # (BT, 6)

    # --- fused context projection on the MXU, f32 accumulation ---
    acc = jnp.dot(embn_ref[...], w1_ref[...], preferred_element_type=jnp.float32)
    acc = acc + jnp.dot(emba_ref[...], w2_ref[...], preferred_element_type=jnp.float32)
    acc = acc + jnp.dot(small, wsmall_ref[...], preferred_element_type=jnp.float32)
    acc = acc + bfused_ref[...]
    out_ref[...] = acc.astype(out_ref.dtype)


def _round_up(v, m):
    return (v + m - 1) // m * m


def pvrp_seq_context_embedding(embeddings, td, params,
                               demand_scaler=40.0, speed_scaler=1.0):
    B, N, H = embeddings.shape
    A = td["agents_speed"].shape[-1]
    num_clients = N - A

    agent_idx = td["current_agent_idx"][:, 0].astype(jnp.int32)      # [B]
    bar = jnp.arange(B)
    cur_node = td["current_node"][bar, agent_idx].astype(jnp.int32)  # [B]

    # Gather only the two needed embedding rows; keep them in their native dtype
    # (bf16 inputs stay bf16 on the dominant HBM stream).
    emb_node = embeddings[bar, cur_node]                             # [B, H]
    emb_agent = embeddings[bar, agent_idx]                           # [B, H]

    # Per-batch scalars of the current agent (+ its index as float for the global feature).
    ascal = jnp.stack(
        [td["current_length"][bar, agent_idx],
         td["agents_speed"][bar, agent_idx],
         td["agents_capacity"][bar, agent_idx],
         td["used_capacity"][bar, agent_idx],
         agent_idx.astype(jnp.float32)],
        axis=-1).astype(jnp.float32)                                 # [B, 5]

    # Lane-major coordinate planes (no (B,2,N) sublane-padded block, no transpose pass).
    locs = td["locs"].astype(jnp.float32)
    x = locs[..., 0]                                                 # [B, N]
    y = locs[..., 1]                                                 # [B, N]
    vis = td["visited"].astype(jnp.int8).reshape(B, N)               # [B, N] int8 (1 B/elt)

    # Fuse the two small projections into the context projection.
    W_ctx = params["W_ctx"].astype(jnp.float32)                      # (4H, H)
    W1 = W_ctx[:H]                                                   # (H, H) current node
    W2 = W_ctx[H:2 * H]                                              # (H, H) current agent
    W_small = jnp.concatenate(
        [params["W_agent"].astype(jnp.float32) @ W_ctx[2 * H:3 * H],
         params["W_global"].astype(jnp.float32) @ W_ctx[3 * H:]], axis=0)  # (6, H)
    b_fused = (params["b_agent"].astype(jnp.float32) @ W_ctx[2 * H:3 * H]
               + params["b_global"].astype(jnp.float32) @ W_ctx[3 * H:]
               + params["b_ctx"].astype(jnp.float32)).reshape(1, H)

    # --- batch-tile selection (VMEM-aware, multiple of 8, >=2 grid steps for large B) ---
    emb_itemsize = jnp.dtype(embeddings.dtype).itemsize
    per_row_bytes = (2 * H * emb_itemsize      # two embedding rows
                     + 2 * N * 4               # x, y
                     + N * 1                   # visited int8
                     + 128 * 4                 # ascal (lane-padded)
                     + H * 4)                  # output row
    vmem_budget = 24 * 1024 * 1024             # double-buffer budget, safe on v5e/v6e/v7x
    bt_vmem = max(8, (vmem_budget // (2 * per_row_bytes)) // 8 * 8)
    BT = max(8, min(512, bt_vmem, _round_up(pl.cdiv(B, 2), 8)))
    B_pad = _round_up(B, BT)

    if B_pad != B:
        pad = B_pad - B
        emb_node = jnp.pad(emb_node, ((0, pad), (0, 0)))
        emb_agent = jnp.pad(emb_agent, ((0, pad), (0, 0)))
        x = jnp.pad(x, ((0, pad), (0, 0)))
        y = jnp.pad(y, ((0, pad), (0, 0)))
        vis = jnp.pad(vis, ((0, pad), (0, 0)))
        ascal = jnp.pad(ascal, ((0, pad), (0, 0)), constant_values=1.0)  # speed=1 avoids div-by-0

    kernel = functools.partial(
        _context_kernel, num_agents=A, num_clients=num_clients,
        demand_scaler=float(demand_scaler), speed_scaler=float(speed_scaler))

    grid_spec = pltpu.PrefetchScalarGridSpec(
        num_scalar_prefetch=0,
        grid=(B_pad // BT,),
        in_specs=[
            pl.BlockSpec((BT, H), lambda i: (i, 0)),      # current-node embedding rows
            pl.BlockSpec((BT, H), lambda i: (i, 0)),      # current-agent embedding rows
            pl.BlockSpec((BT, N), lambda i: (i, 0)),      # x coords (lane-major)
            pl.BlockSpec((BT, N), lambda i: (i, 0)),      # y coords (lane-major)
            pl.BlockSpec((BT, N), lambda i: (i, 0)),      # visited int8
            pl.BlockSpec((BT, 5), lambda i: (i, 0)),      # per-agent scalars
            pl.BlockSpec((H, H), lambda i: (0, 0)),       # W_ctx[:H]
            pl.BlockSpec((H, H), lambda i: (0, 0)),       # W_ctx[H:2H]
            pl.BlockSpec((6, H), lambda i: (0, 0)),       # fused small projection
            pl.BlockSpec((1, H), lambda i: (0, 0)),       # fused bias
        ],
        out_specs=pl.BlockSpec((BT, H), lambda i: (i, 0)),
    )

    # Raise the scoped VMEM limit when larger tiles need it (v5e defaults to 16 MiB);
    # stay below v7x's 64 MiB physical per-TC capacity.
    weight_bytes = (2 * H * H + 8 * H + 8 * H) * 4
    dbuf_bytes = 2 * per_row_bytes * BT + 2 * weight_bytes
    vmem_limit = int(min(56 * 1024 * 1024,
                         max(32 * 1024 * 1024, dbuf_bytes + (8 << 20))))

    out = pl.pallas_call(
        kernel,
        out_shape=jax.ShapeDtypeStruct((B_pad, H), embeddings.dtype),
        grid_spec=grid_spec,
        compiler_params=pltpu.CompilerParams(
            dimension_semantics=("parallel",),
            vmem_limit_bytes=vmem_limit),
    )(emb_node, emb_agent, x, y, vis, ascal, W1, W2, W_small, b_fused)

    return out[:B]                                                    # [B, H]


def reference(embeddings, td, params, demand_scaler=40.0, speed_scaler=1.0):
    """Plain-JAX reproduction of the PyTorch forward for validation."""
    B, N, H = embeddings.shape
    A = td["agents_speed"].shape[-1]
    num_clients = N - A
    a = td["current_agent_idx"][:, 0]
    bar = jnp.arange(B)

    cur_pos = td["current_node"][bar, a]
    cur_node_emb = embeddings[bar, cur_pos]                 # [B, H]
    cur_agent_emb = embeddings[bar, a]                      # [B, H]

    ctx_feats = jnp.stack(
        [td["current_length"] / (td["agents_speed"] / speed_scaler),
         (td["agents_capacity"] - td["used_capacity"]) / demand_scaler], axis=-1)  # [B, A, 2]
    depot = td["locs"][:, 0:1, :]
    dist = jnp.linalg.norm(td["locs"] - depot, axis=-1, keepdims=True)   # [B, N, 1]
    max_dist = jnp.max(dist, axis=-2, keepdims=True)                     # [B, 1, 1]
    remain_max = jnp.max(dist * (~td["visited"])[..., None].astype(dist.dtype),
                         axis=-2, keepdims=True)
    max_t = max_dist / (td["agents_speed"][..., None] / speed_scaler)    # [B, A, 1]
    remain_t = remain_max / (td["agents_speed"][..., None] / speed_scaler)
    ctx_feats = jnp.concatenate([ctx_feats, max_t, remain_t], axis=-1)   # [B, A, 4]
    ctx_feats = ctx_feats[bar, a]                                        # [B, 4]
    agent_embed = ctx_feats @ params["W_agent"] + params["b_agent"]

    g0 = jnp.sum(td["visited"][:, A:].astype(jnp.float32), axis=-1, keepdims=True) / num_clients
    g1 = td["current_agent_idx"].astype(jnp.float32) + 1.0 / A
    gfeats = jnp.concatenate([g0, g1], axis=-1)                          # [B, 2]
    global_embed = gfeats @ params["W_global"] + params["b_global"]

    ctx = jnp.concatenate([cur_node_emb, cur_agent_emb, agent_embed, global_embed], axis=-1)
    return ctx @ params["W_ctx"] + params["b_ctx"]


if __name__ == "__main__":
    B, A, N, H = 2, 3, 16, 32   # batch, num_agents, num nodes (agents+clients), embed_dim
    key = jax.random.PRNGKey(0)
    ks = jax.random.split(key, 16)

    embeddings = jax.random.normal(ks[0], (B, N, H), jnp.float32)
    locs = jax.random.uniform(ks[1], (B, N, 2), jnp.float32)
    visited = jax.random.bernoulli(ks[2], 0.4, (B, N))
    current_length = jax.random.uniform(ks[3], (B, A), jnp.float32, 0.0, 2.0)
    agents_speed = jax.random.uniform(ks[4], (B, A), jnp.float32, 0.5, 1.5)
    agents_capacity = jax.random.uniform(ks[5], (B, A), jnp.float32, 30.0, 50.0)
    used_capacity = jax.random.uniform(ks[6], (B, A), jnp.float32, 0.0, 20.0)
    current_node = jax.random.randint(ks[7], (B, A), 0, N, jnp.int32)
    current_agent_idx = jax.random.randint(ks[8], (B, 1), 0, A, jnp.int32)

    td = dict(locs=locs, visited=visited, current_length=current_length,
              agents_speed=agents_speed, agents_capacity=agents_capacity,
              used_capacity=used_capacity, current_node=current_node,
              current_agent_idx=current_agent_idx)

    # parameter init (shapes from nn.Linear(4,H), Linear(2,H), Linear(4H,H); W stored [in, out])
    params = dict(
        W_agent=0.1 * jax.random.normal(ks[9], (4, H), jnp.float32),
        b_agent=0.1 * jax.random.normal(ks[10], (H,), jnp.float32),
        W_global=0.1 * jax.random.normal(ks[11], (2, H), jnp.float32),
        b_global=0.1 * jax.random.normal(ks[12], (H,), jnp.float32),
        W_ctx=0.1 * jax.random.normal(ks[13], (4 * H, H), jnp.float32),
        b_ctx=0.1 * jax.random.normal(ks[14], (H,), jnp.float32),
    )

    out = pvrp_seq_context_embedding(embeddings, td, params)
    out = jax.block_until_ready(out)

    ref = jax.block_until_ready(reference(embeddings, td, params))
    assert out.shape == (B, H), out.shape
    np.testing.assert_allclose(np.asarray(out), np.asarray(ref), rtol=1e-4, atol=1e-4)
    print("KERNEL_OK")
</pallas_src>

<mosaic_0001>
module attributes {stable_mosaic.version = 11 : i64} {
  func.func @_context_kernel(%arg0: i32, %arg1: memref<8x32xf32, #tpu.memory_space<vmem>>, %arg2: memref<8x32xf32, #tpu.memory_space<vmem>>, %arg3: memref<8x16xf32, #tpu.memory_space<vmem>>, %arg4: memref<8x16xf32, #tpu.memory_space<vmem>>, %arg5: memref<8x16xi8, #tpu.memory_space<vmem>>, %arg6: memref<8x5xf32, #tpu.memory_space<vmem>>, %arg7: memref<32x32xf32, #tpu.memory_space<vmem>>, %arg8: memref<32x32xf32, #tpu.memory_space<vmem>>, %arg9: memref<6x32xf32, #tpu.memory_space<vmem>>, %arg10: memref<1x32xf32, #tpu.memory_space<vmem>>, %arg11: memref<8x32xf32, #tpu.memory_space<vmem>>) attributes {dimension_semantics = [#tpu.dimension_semantics<parallel>], iteration_bounds = array<i64: 1>, scalar_prefetch = 0 : i64, scratch_operands = 0 : i64, tpu.core_type = #tpu.core_type<tc>, window_params = [{transform_indices = @transform_0, window_bounds = array<i64: 8, 32>}, {transform_indices = @transform_1, window_bounds = array<i64: 8, 32>}, {transform_indices = @transform_2, window_bounds = array<i64: 8, 16>}, {transform_indices = @transform_3, window_bounds = array<i64: 8, 16>}, {transform_indices = @transform_4, window_bounds = array<i64: 8, 16>}, {transform_indices = @transform_5, window_bounds = array<i64: 8, 5>}, {pipeline_mode = #tpu.pipeline_mode<synchronous>, transform_indices = @transform_6, window_bounds = array<i64: 32, 32>}, {pipeline_mode = #tpu.pipeline_mode<synchronous>, transform_indices = @transform_7, window_bounds = array<i64: 32, 32>}, {pipeline_mode = #tpu.pipeline_mode<synchronous>, transform_indices = @transform_8, window_bounds = array<i64: 6, 32>}, {pipeline_mode = #tpu.pipeline_mode<synchronous>, transform_indices = @transform_9, window_bounds = array<i64: 1, 32>}, {transform_indices = @transform_10, window_bounds = array<i64: 8, 32>}]} {
    %c0 = arith.constant 0 : index
    %c0_0 = arith.constant 0 : index
    %0 = vector.load %arg3[%c0, %c0_0] : memref<8x16xf32, #tpu.memory_space<vmem>>, vector<8x16xf32>
    %c0_1 = arith.constant 0 : index
    %c0_2 = arith.constant 0 : index
    %1 = vector.load %arg4[%c0_1, %c0_2] : memref<8x16xf32, #tpu.memory_space<vmem>>, vector<8x16xf32>
    %2 = vector.extract_strided_slice %0 {offsets = [0, 0], sizes = [8, 1], strides = [1, 1]} : vector<8x16xf32> to vector<8x1xf32>
    %3 = vector.broadcast %2 : vector<8x1xf32> to vector<8x16xf32>
    %4 = arith.subf %0, %3 : vector<8x16xf32>
    %5 = vector.extract_strided_slice %1 {offsets = [0, 0], sizes = [8, 1], strides = [1, 1]} : vector<8x16xf32> to vector<8x1xf32>
    %6 = vector.broadcast %5 : vector<8x1xf32> to vector<8x16xf32>
    %7 = arith.subf %1, %6 : vector<8x16xf32>
    %8 = arith.mulf %4, %4 : vector<8x16xf32>
    %9 = arith.mulf %7, %7 : vector<8x16xf32>
    %10 = arith.addf %8, %9 : vector<8x16xf32>
    %11 = math.sqrt %10 : vector<8x16xf32>
    %c0_3 = arith.constant 0 : index
    %c0_4 = arith.constant 0 : index
    %12 = vector.load %arg5[%c0_3, %c0_4] : memref<8x16xi8, #tpu.memory_space<vmem>>, vector<8x16xi8>
    %13 = arith.sitofp %12 : vector<8x16xi8> to vector<8x16xf32>
    %cst = arith.constant dense<0xFF800000> : vector<8xf32>
    %14 = vector.multi_reduction <maximumf>, %11, %cst [1] : vector<8x16xf32> to vector<8xf32>
    %15 = vector.shape_cast %14 : vector<8xf32> to vector<8x1xf32>
    %cst_5 = arith.constant 1.000000e+00 : f32
    %16 = vector.broadcast %cst_5 : f32 to vector<8x16xf32>
    %17 = arith.subf %16, %13 : vector<8x16xf32>
    %18 = arith.mulf %11, %17 : vector<8x16xf32>
    %cst_6 = arith.constant dense<0xFF800000> : vector<8xf32>
    %19 = vector.multi_reduction <maximumf>, %18, %cst_6 [1] : vector<8x16xf32> to vector<8xf32>
    %20 = vector.shape_cast %19 : vector<8xf32> to vector<8x1xf32>
    %c0_7 = arith.constant 0 : index
    %c0_8 = arith.constant 0 : index
    %21 = vector.load %arg6[%c0_7, %c0_8] : memref<8x5xf32, #tpu.memory_space<vmem>>, vector<8x5xf32>
    %22 = vector.extract_strided_slice %21 {offsets = [0, 0], sizes = [8, 1], strides = [1, 1]} : vector<8x5xf32> to vector<8x1xf32>
    %23 = vector.extract_strided_slice %21 {offsets = [0, 1], sizes = [8, 1], strides = [1, 1]} : vector<8x5xf32> to vector<8x1xf32>
    %24 = vector.extract_strided_slice %21 {offsets = [0, 2], sizes = [8, 1], strides = [1, 1]} : vector<8x5xf32> to vector<8x1xf32>
    %25 = vector.extract_strided_slice %21 {offsets = [0, 3], sizes = [8, 1], strides = [1, 1]} : vector<8x5xf32> to vector<8x1xf32>
    %26 = vector.extract_strided_slice %21 {offsets = [0, 4], sizes = [8, 1], strides = [1, 1]} : vector<8x5xf32> to vector<8x1xf32>
    %cst_9 = arith.constant 1.000000e+00 : f32
    %27 = vector.broadcast %cst_9 : f32 to vector<8x1xf32>
    %28 = arith.divf %27, %23 : vector<8x1xf32>
    %29 = arith.mulf %22, %28 : vector<8x1xf32>
    %30 = arith.subf %24, %25 : vector<8x1xf32>
    %cst_10 = arith.constant 2.500000e-02 : f32
    %31 = vector.broadcast %cst_10 : f32 to vector<8x1xf32>
    %32 = arith.mulf %30, %31 : vector<8x1xf32>
    %33 = arith.mulf %15, %28 : vector<8x1xf32>
    %34 = arith.mulf %20, %28 : vector<8x1xf32>
    %cst_11 = arith.constant dense<0.000000e+00> : vector<8xf32>
    %35 = vector.multi_reduction <add>, %13, %cst_11 [1] : vector<8x16xf32> to vector<8xf32>
    %36 = vector.shape_cast %35 : vector<8xf32> to vector<8x1xf32>
    %37 = vector.extract_strided_slice %13 {offsets = [0, 0], sizes = [8, 3], strides = [1, 1]} : vector<8x16xf32> to vector<8x3xf32>
    %cst_12 = arith.constant dense<0.000000e+00> : vector<8xf32>
    %38 = vector.multi_reduction <add>, %37, %cst_12 [1] : vector<8x3xf32> to vector<8xf32>
    %39 = vector.shape_cast %38 : vector<8xf32> to vector<8x1xf32>
    %40 = arith.subf %36, %39 : vector<8x1xf32>
    %cst_13 = arith.constant 0.0769230798 : f32
    %41 = vector.broadcast %cst_13 : f32 to vector<8x1xf32>
    %42 = arith.mulf %40, %41 : vector<8x1xf32>
    %cst_14 = arith.constant 0.333333343 : f32
    %43 = vector.broadcast %cst_14 : f32 to vector<8x1xf32>
    %44 = arith.addf %26, %43 : vector<8x1xf32>
    %45 = tpu.concatenate %29, %32, %33, %34, %42, %44 in 1 : vector<8x1xf32>, vector<8x1xf32>, vector<8x1xf32>, vector<8x1xf32>, vector<8x1xf32>, vector<8x1xf32> -> vector<8x6xf32>
    %c0_15 = arith.constant 0 : index
    %c0_16 = arith.constant 0 : index
    %46 = vector.load %arg1[%c0_15, %c0_16] : memref<8x32xf32, #tpu.memory_space<vmem>>, vector<8x32xf32>
    %c0_17 = arith.constant 0 : index
    %c0_18 = arith.constant 0 : index
    %47 = vector.load %arg7[%c0_17, %c0_18] : memref<32x32xf32, #tpu.memory_space<vmem>>, vector<32x32xf32>
    %cst_19 = arith.constant dense<0.000000e+00> : vector<8x32xf32>
    %48 = tpu.matmul %46, %47, %cst_19 {dimension_numbers = #tpu.dot_dimension_numbers<[1], [0], [0], [1], [0, 0, 1, 1], [], []>} : vector<8x32xf32>, vector<32x32xf32>, vector<8x32xf32> -> vector<8x32xf32>
    %c0_20 = arith.constant 0 : index
    %c0_21 = arith.constant 0 : index
    %49 = vector.load %arg2[%c0_20, %c0_21] : memref<8x32xf32, #tpu.memory_space<vmem>>, vector<8x32xf32>
    %c0_22 = arith.constant 0 : index
    %c0_23 = arith.constant 0 : index
    %50 = vector.load %arg8[%c0_22, %c0_23] : memref<32x32xf32, #tpu.memory_space<vmem>>, vector<32x32xf32>
    %cst_24 = arith.constant dense<0.000000e+00> : vector<8x32xf32>
    %51 = tpu.matmul %49, %50, %cst_24 {dimension_numbers = #tpu.dot_dimension_numbers<[1], [0], [0], [1], [0, 0, 1, 1], [], []>} : vector<8x32xf32>, vector<32x32xf32>, vector<8x32xf32> -> vector<8x32xf32>
    %52 = arith.addf %48, %51 : vector<8x32xf32>
    %c0_25 = arith.constant 0 : index
    %c0_26 = arith.constant 0 : index
    %53 = vector.load %arg9[%c0_25, %c0_26] : memref<6x32xf32, #tpu.memory_space<vmem>>, vector<6x32xf32>
    %cst_27 = arith.constant dense<0.000000e+00> : vector<8x32xf32>
    %54 = tpu.matmul %45, %53, %cst_27 {dimension_numbers = #tpu.dot_dimension_numbers<[1], [0], [0], [1], [0, 0, 1, 1], [], []>} : vector<8x6xf32>, vector<6x32xf32>, vector<8x32xf32> -> vector<8x32xf32>
    %55 = arith.addf %52, %54 : vector<8x32xf32>
    %c0_28 = arith.constant 0 : index
    %c0_29 = arith.constant 0 : index
    %56 = vector.load %arg10[%c0_28, %c0_29] : memref<1x32xf32, #tpu.memory_space<vmem>>, vector<1x32xf32>
    %57 = vector.broadcast %56 : vector<1x32xf32> to vector<8x32xf32>
    %58 = arith.addf %55, %57 : vector<8x32xf32>
    %c0_30 = arith.constant 0 : index
    %c0_31 = arith.constant 0 : index
    %59 = vector.load %arg11[%c0_30, %c0_31] : memref<8x32xf32, #tpu.memory_space<vmem>>, vector<8x32xf32>
    tpu.vector_store %arg11[%c0_30, %c0_31], %58 {strides = array<i32>} : memref<8x32xf32, #tpu.memory_space<vmem>>, vector<8x32xf32>,
    return
  }
  func.func @transform_0(%arg0: i32) -> (i32, i32) {
    %c0_i32 = arith.constant 0 : i32
    %c0_i32_0 = arith.constant 0 : i32
    return %arg0, %c0_i32 : i32, i32
  }
  func.func @transform_1(%arg0: i32) -> (i32, i32) {
    %c0_i32 = arith.constant 0 : i32
    %c0_i32_0 = arith.constant 0 : i32
    return %arg0, %c0_i32 : i32, i32
  }
  func.func @transform_2(%arg0: i32) -> (i32, i32) {
    %c0_i32 = arith.constant 0 : i32
    %c0_i32_0 = arith.constant 0 : i32
    return %arg0, %c0_i32 : i32, i32
  }
  func.func @transform_3(%arg0: i32) -> (i32, i32) {
    %c0_i32 = arith.constant 0 : i32
    %c0_i32_0 = arith.constant 0 : i32
    return %arg0, %c0_i32 : i32, i32
  }
  func.func @transform_4(%arg0: i32) -> (i32, i32) {
    %c0_i32 = arith.constant 0 : i32
    %c0_i32_0 = arith.constant 0 : i32
    return %arg0, %c0_i32 : i32, i32
  }
  func.func @transform_5(%arg0: i32) -> (i32, i32) {
    %c0_i32 = arith.constant 0 : i32
    %c0_i32_0 = arith.constant 0 : i32
    return %arg0, %c0_i32 : i32, i32
  }
  func.func @transform_6(%arg0: i32) -> (i32, i32) {
    %c0_i32 = arith.constant 0 : i32
    %c0_i32_0 = arith.constant 0 : i32
    %c0_i32_1 = arith.constant 0 : i32
    return %c0_i32, %c0_i32_0 : i32, i32
  }
  func.func @transform_7(%arg0: i32) -> (i32, i32) {
    %c0_i32 = arith.constant 0 : i32
    %c0_i32_0 = arith.constant 0 : i32
    %c0_i32_1 = arith.constant 0 : i32
    return %c0_i32, %c0_i32_0 : i32, i32
  }
  func.func @transform_8(%arg0: i32) -> (i32, i32) {
    %c0_i32 = arith.constant 0 : i32
    %c0_i32_0 = arith.constant 0 : i32
    %c0_i32_1 = arith.constant 0 : i32
    return %c0_i32, %c0_i32_0 : i32, i32
  }
  func.func @transform_9(%arg0: i32) -> (i32, i32) {
    %c0_i32 = arith.constant 0 : i32
    %c0_i32_0 = arith.constant 0 : i32
    %c0_i32_1 = arith.constant 0 : i32
    return %c0_i32, %c0_i32_0 : i32, i32
  }
  func.func @transform_10(%arg0: i32) -> (i32, i32) {
    %c0_i32 = arith.constant 0 : i32
    %c0_i32_0 = arith.constant 0 : i32
    return %arg0, %c0_i32 : i32, i32
  }
}

</mosaic_0001>

<bundles_post_ra>
// kernel: tpu_custom_call.1
= control target key start
LH: loop header
LB: loop body
LE: loop exit
PB: predicated region body
PF: predicated region fallthrough
CT: control target
= control target key end

     0   :  { %15 = vsyncpa [#allocation3], 0  ;;  %s749_s0 = inlined_call_operand.hbm [shape: f32[8,32], index: 0, kind: input, shape index: {}]   ;;  %s750_s1 = inlined_call_operand.hbm [shape: f32[8,32], index: 1, kind: input, shape index: {}]   ;;  %s751_s2 = inlined_call_operand.hbm [shape: f32[8,16], index: 2, kind: input, shape index: {}]   ;;  %s752_s3 = inlined_call_operand.hbm [shape: f32[8,16], index: 3, kind: input, shape index: {}]   ;;  %s753_s4 = inlined_call_operand.vmem [shape: s8[8,16], index: 4, kind: input, shape index: {}]   ;;  %s754_s5 = inlined_call_operand.hbm [shape: f32[8,5], index: 5, kind: input, shape index: {}]   ;;  %s755_s6 = inlined_call_operand.hbm [shape: f32[32,32], index: 6, kind: input, shape index: {}]   ;;  %s756_s7 = inlined_call_operand.hbm [shape: f32[32,32], index: 7, kind: input, shape index: {}]   ;;  %s757_s8 = inlined_call_operand.hbm [shape: f32[6,32], index: 8, kind: input, shape index: {}]   ;;  %s758_s9 = inlined_call_operand.vmem [shape: f32[1,32], index: 9, kind: input, shape index: {}]   ;;  %s759_s10 = inlined_call_operand.hbm [shape: f32[8,32], index: 10, kind: output, shape index: {}]  }
   0x1   :  { %16 = vsyncpa [#allocation6], 0 }
   0x2   :  { %17 = vsyncpa [#allocation9], 0 }
   0x3   :  { %18 = vsyncpa [#allocation12], 0 }
   0x4   :  { %19 = vsyncpa [#allocation15], 0  ;;  %s37_s15 = sshll.u32 %s750_s1, 4  ;;  %s38_s15 = int_to_ptr.hbm [resolvable:$true] %s37_s15 }
   0x5   :  { %20 = vsyncpa [#allocation4], 0  ;;  %s621_s16 = smov [#allocation5]   ;;  %s59_s20 = sshll.u32 %s752_s3, 4  ;;  %s60_s20 = int_to_ptr.hbm [resolvable:$true] %s59_s20 }
   0x6   :  { %s39_s17 = sshll.u32 %s621_s16, 4  ;;  %s622_s21 = smov [#allocation8]   ;;  %s40_s17 = int_to_ptr.vmem [resolvable:$true] %s39_s17 }
   0x7   :  { %42 = dma.hbm_to_vmem [thread:$0]  %s38_s15, 128, %s40_s17, [#allocation6]  }
   0x8   :  { %s61_s22 = sshll.u32 %s622_s21, 4  ;;  %s82_s25 = sshll.u32 %s755_s6, 4  ;;  %s62_s22 = int_to_ptr.vmem [resolvable:$true] %s61_s22  ;;  %s83_s25 = int_to_ptr.hbm [resolvable:$true] %s82_s25 }
   0x9   :  { %64 = dma.hbm_to_vmem [thread:$0]  %s60_s20, 128, %s62_s22, [#allocation9]  }
   0xa   :  { %s623_s1 = smov [#allocation11]   ;;  %s26_s29 = sshll.u32 %s749_s0, 4  ;;  %s27_s29 = int_to_ptr.hbm [resolvable:$true] %s26_s29 }
   0xb   :  { %s84_s26 = sshll.u32 %s623_s1, 4  ;;  %s624_s30 = smov 128   ;;  %s85_s26 = int_to_ptr.vmem [resolvable:$true] %s84_s26 }
   0xc   :  { %s625_s3 = smov 8   ;;  %s626_s11 = smov [#allocation2]  }
   0xd   :  { %90 = dma.hbm_to_vmem [thread:$0]  %s83_s25, 512, %s85_s26, [#allocation12], %s624_s30, %s624_s30, %s625_s3  }
   0xe   :  { %s28_s12 = sshll.u32 %s626_s11, 4  ;;  %s48_s14 = sshll.u32 %s751_s2, 4  ;;  %s29_s12 = int_to_ptr.vmem [resolvable:$true] %s28_s12  ;;  %s49_s14 = int_to_ptr.hbm [resolvable:$true] %s48_s14 }
   0xf   :  { %31 = dma.hbm_to_vmem [thread:$0]  %s27_s29, 128, %s29_s12, [#allocation3]  }
  0x10   :  { %s72_s0 = sshll.u32 %s754_s5, 4  ;;  %s627_s17 = smov [#allocation7]   ;;  %s73_s0 = int_to_ptr.hbm [resolvable:$true] %s72_s0 }
  0x11   :  { %s50_s18 = sshll.u32 %s627_s17, 4  ;;  %s628_s19 = smov [#allocation10]   ;;  %s51_s18 = int_to_ptr.vmem [resolvable:$true] %s50_s18 }
  0x12   :  { %53 = dma.hbm_to_vmem [thread:$0]  %s49_s14, 128, %s51_s18, [#allocation6]  }
  0x13   :  { %s74_s20 = sshll.u32 %s628_s19, 4  ;;  %s95_s23 = sshll.u32 %s756_s7, 4  ;;  %s75_s20 = int_to_ptr.vmem [resolvable:$true] %s74_s20  ;;  %s96_s23 = int_to_ptr.hbm [resolvable:$true] %s95_s23 }
  0x14   :  { %77 = dma.hbm_to_vmem [thread:$0]  %s73_s0, 128, %s75_s20, [#allocation9]  }
  0x15   :  { %s109_s25 = sshll.u32 %s757_s8, 4  ;;  %s629_s1 = smov [#allocation13]   ;;  %s110_s25 = int_to_ptr.hbm [resolvable:$true] %s109_s25 }
  0x16   :  { %s97_s5 = sshll.u32 %s629_s1, 4  ;;  %s630_s26 = smov [#allocation14]   ;;  %s98_s5 = int_to_ptr.vmem [resolvable:$true] %s97_s5 }
  0x17   :  { %103 = dma.hbm_to_vmem [thread:$0]  %s96_s23, 512, %s98_s5, [#allocation12], %s624_s30, %s624_s30, %s625_s3  }
  0x18   :  { %s111_s27 = sshll.u32 %s630_s26, 4  ;;  %s112_s27 = int_to_ptr.vmem [resolvable:$true] %s111_s27 }
  0x19   :  { %114 = dma.hbm_to_vmem [thread:$0]  %s110_s25, 128, %s112_s27, [#allocation15]  }
  0x1a   :  { %609 = dma.done.wait [#allocation3], 128  }
  0x1b   :  { %610 = vsyncadd [#allocation3], 4294967168 }
  0x1c   :  { %611 = dma.done.wait [#allocation6], 256  }
  0x1d   :  { %612 = vsyncadd [#allocation6], 4294967040 }
  0x1e   :  { %613 = dma.done.wait [#allocation9], 256  }
  0x1f   :  { %614 = vsyncadd [#allocation9], 4294967040 }
  0x20   :  { %615 = dma.done.wait [#allocation12], 1024  }
  0x21   :  { %616 = vsyncadd [#allocation12], 4294966272 }
  0x22   :  { %617 = dma.done.wait [#allocation15], 128  }
  0x23   :  { %618 = vsyncadd [#allocation15], 4294967168  ;;  %v631_v0 = vmov 0   ;;  %v149_v1 = vld [vmem:[#allocation7] sm:$0xff]  ;;  %v721_v2 = vld [vmem:[#allocation10] sm:$0xff]  ;;  %s632_s7 = smov 127  }
  0x24   :  { %387 = vset.pattern.permute.xlu0 %v631_v0  ;;  %212 = vrot.lane.b32.xlu1 %v721_v2, %s632_s7  ;;  %389 = vrcp.f32 %v721_v2  ;;  %v150_v3 = vld [vmem:[#allocation8] sm:$0xff]  ;;  %v202_v6 = vand.u32 2147483648, %v721_v2  ;;  %vm196_vm0 = vweird.f32 %v721_v2  ;;  %v200_v8 = vand.u32 2147483647, %v721_v2  ;;  %v178_v22 = vld [vmem:[%s753_s4] sm:$0x3] }
  0x25   :  { %153 = vperm.xlu0 %387, %v149_v1   ;;  %v179_v25 = vunpack.c.0.s8 %v178_v22  ;;  %vm181_vm4 = vcmask 130048   ;;  %vm222_vm7 = vcmask 23552   ;;  %v228_v43 = vadd.f32 0.33333334, %v721_v2  ;;  %s633_s4 = smov 1   ;;  %s634_s29 = smov 2  }
  0x26   :  { %v203_v10 = vor.u32 1.1754944e-38, %v202_v6  ;;  %vm201_vm3 = vcmp.eq.f32.partialorder %v200_v8, 8.507059e+37  ;;  %v263_v49 = vld [vmem:[#allocation13 + $0x18] sm:$0xff]  ;;  %v262_v51 = vld [vmem:[#allocation13 + $0x10] sm:$0xff]  ;;  %v311_v53 = vld [vmem:[#allocation14] sm:$0x3f] }
  0x27   :  { %v180_v28 = vcvt.s32.f32 %v179_v25  ;;  %v258_v50 = vld [vmem:[#allocation11 + $0x18] sm:$0xff]  ;;  %280 = vmatpush.msra.mxu0 %v263_v49  ;;  %v257_v52 = vld [vmem:[#allocation11 + $0x10] sm:$0xff]  ;;  %vm316_vm8 = vcmask 1045504   ;;  %v261_v54 = vld [vmem:[#allocation13 + $0x8] sm:$0xff]  ;;  %vm264_vm9 = vcmask 261120   ;;  %vm245_vm10 = vcmask 7168  }
  0x28   :  { %303 = vmatpush.msra.mxu1 %v258_v50  ;;  %370 = vmatpush.msk.msra.mxu2 %vm316_vm8, %v311_v53  ;;  %v256_v55 = vld [vmem:[#allocation11 + $0x8] sm:$0xff]  ;;  %v260_v56 = vld [vmem:[#allocation13] sm:$0xff]  ;;  %v254_v59 = vld [vmem:[#allocation2] sm:$0xff]  ;;  %vm247_vm11 = vcmask 15360   ;;  %vm250_vm12 = vcmask 31744   ;;  %vm252_vm13 = vcmask 39936  }
  0x29   :  { %v219_v30 = vsel %vm181_vm4, %v180_v28, 0.0  ;;  %v185_v32 = vsub.f32 1.0, %v180_v28  ;;  %v223_v39 = vsel %vm222_vm7, %v180_v28, 0.0  ;;  %281 = vmatpush.msra.mxu0 %v262_v51  ;;  %v255_v57 = vld [vmem:[#allocation11] sm:$0xff]  ;;  %vm312_vm14 = vcmask 48128   ;;  %s635_s11 = smov [#allocation16]  }
  0x2a   :  { %v390_v4 = vpop.eup %389  ;;  %304 = vmatpush.msra.mxu1 %v257_v52  ;;  %v259_v58 = vld [vmem:[#allocation5] sm:$0xff]  ;;  %s352_s12 = sshll.u32 %s635_s11, 4  ;;  %s354_s14 = sshll.u32 %s759_s10, 4  ;;  %s353_s12 = int_to_ptr.vmem [resolvable:$true] %s352_s12  ;;  %s355_s14 = int_to_ptr.hbm [resolvable:$true] %s354_s14 }
  0x2b   :  { %v192_v5 = vmul.f32 %v390_v4, %v721_v2  ;;  %vm197_vm1 = vweird.f32 %v390_v4  ;;  %282 = vmatpush.msra.mxu0 %v261_v54 }
  0x2c   :  { %vm198_vm2 = vmor %vm196_vm0, %vm197_vm1  ;;  %305 = vmatpush.msra.mxu1 %v256_v55 }
  0x2d   :  { %159 = vperm.xlu0 %387, %v150_v3   ;;  %v193_v7 = vsub.f32 1.0, %v192_v5  ;;  %283 = vmatpush.msra.mxu0 %v260_v56 }
  0x2e   :  { %306 = vmatpush.msra.mxu1 %v255_v57  ;;  %368 = vmatmul.msk.f32.vlgmr.msra.gmra.mxu0 %vm264_vm9, %v259_v58 }
  0x2f   :  { %v194_v9 = vmul.f32 %v390_v4, %v193_v7  ;;  %369 = vmatmul.msk.f32.vlgmr.msra.gmra.mxu1 %vm264_vm9, %v254_v59 }
  0x31   :  { %v195_v11 = vadd.f32 %v390_v4, %v194_v9 }
  0x33   :  { %v199_v12 = vsel %vm198_vm2, %v390_v4, %v195_v11 }
  0x34   :  { %v204_v13 = vsel %vm201_vm3, %v203_v10, %v199_v12 }
  0x35   :  { %207 = vrot.lane.b32.xlu2 %v204_v13, %s632_s7 }
  0x57   :  { %220 = vadd.xlane.f32.xlu0 %v219_v30 }
  0x8f   :  { %v208_v44 = vpop.permute.xlu2 %207 }
  0x90   :  { %v210_v0 = vmul.f32 %v208_v44, %v721_v2 }
  0x96   :  { %v213_v40 = vpop.permute.xlu1 %212 }
  0x97   :  { %v154_v14 = vpop.permute.xlu0 %153  ;;  %v215_v41 = vsub.f32 %v721_v2, %v213_v40  ;;  %v388_v2 = vld [vmem:[%s758_s9] ss:$0 sm:$0xff] }
  0x98   :  { %v156_v15 = vsub.f32 %v149_v1, %v154_v14 }
  0x99   :  { %v216_v42 = vmul.f32 0.025, %v215_v41 }
  0x9a   :  { %v163_v18 = vmul.f32 %v156_v15, %v156_v15 }
  0x9f   :  { %v160_v16 = vpop.permute.xlu0 %159 }
  0xa0   :  { %v162_v17 = vsub.f32 %v150_v3, %v160_v16 }
  0xa2   :  { %v164_v19 = vmul.f32 %v162_v17, %v162_v17 }
  0xa4   :  { %v165_v20 = vadd.f32 %v164_v19, %v163_v18 }
  0xa6   :  { %391 = vrsqrt.f32 %v165_v20  ;;  %vm173_vm5 = vcmp.eq.f32.partialorder %v165_v20, inf  ;;  %v176_v33 = vand.u32 2147483648, %v165_v20  ;;  %vm175_vm6 = vcmp.eq.f32.partialorder %v165_v20, 0.0 }
  0xab   :  { %v285_v11 = vpop.f32.mrf.mxu0 }
  0xac   :  { %v392_v21 = vpop.eup %391  ;;  %v308_v12 = vpop.f32.mrf.mxu1 }
  0xad   :  { %v167_v23 = vmul.f32 %v392_v21, %v165_v20 }
  0xaf   :  { %v168_v24 = vmul.f32 %v392_v21, %v167_v23 }
  0xb1   :  { %v169_v26 = vmul.f32 0.5, %v168_v24 }
  0xb3   :  { %v170_v27 = vsub.f32 1.5, %v169_v26 }
  0xb5   :  { %v171_v29 = vmul.f32 %v392_v21, %v170_v27 }
  0xb7   :  { %v172_v31 = vmul.f32 %v171_v29, %v165_v20 }
  0xb9   :  { %v174_v34 = vsel %vm173_vm5, %v165_v20, %v172_v31 }
  0xba   :  { %v177_v35 = vsel %vm175_vm6, %v176_v33, %v174_v34 }
  0xbb   :  { %v182_v36 = vsel %vm181_vm4, %v177_v35, -inf  ;;  %v186_v37 = vmul.f32 %v185_v32, %v177_v35 }
  0xbc   :  { %183 = vmax.xlane.f32.xlu1 %v182_v36 }
  0xbd   :  { %v187_v38 = vsel %vm181_vm4, %v186_v37, -inf }
  0xbe   :  { %188 = vmax.xlane.f32.xlu2 %v187_v38 }
  0xc6   :  { %224 = vadd.xlane.f32.xlu2 %v223_v39 }
  0xca   :  { %v221_v61 = vpop.xlane.xlu0 %220 }
  0xd5   :  { %230 = vrot.lane.b32.xlu1 %v216_v42, %s632_s7 }
  0xdd   :  { %242 = vrot.lane.b32.xlu1 %v228_v43, %s633_s4 }
 0x12f   :  { %v184_v45 = vpop.xlane.xlu1 %183 }
 0x130   :  { %v217_v46 = vmul.f32 %v204_v13, %v184_v45 }
 0x131   :  { %v189_v47 = vpop.xlane.xlu2 %188 }
 0x132   :  { %v218_v48 = vmul.f32 %v204_v13, %v189_v47  ;;  %234 = vrot.lane.b32.xlu0 %v217_v46, %s633_s4  ;;  %v309_v13 = vadd.f32 %v308_v12, %v285_v11 }
 0x134   :  { %238 = vrot.lane.b32.xlu2 %v218_v48, %s634_s29 }
 0x139   :  { %v225_v60 = vpop.xlane.xlu2 %224 }
 0x13a   :  { %v226_v63 = vsub.f32 %v221_v61, %v225_v60 }
 0x13c   :  { %v227_v5 = vmul.f32 0.07692308, %v226_v63 }
 0x147   :  { %v231_v62 = vpop.permute.xlu1 %230 }
 0x148   :  { %v246_v1 = vsel %vm245_vm10, %v210_v0, %v231_v62 }
 0x14f   :  { %v243_v7 = vpop.permute.xlu1 %242 }
 0x18e   :  { %v239_v4 = vpop.permute.xlu2 %238 }
 0x1a4   :  { %v235_v3 = vpop.permute.xlu0 %234 }
 0x1a5   :  { %v248_v6 = vsel %vm247_vm11, %v246_v1, %v235_v3 }
 0x1a6   :  { %v249_v8 = vsel %vm222_vm7, %v248_v6, %v239_v4 }
 0x1a7   :  { %v251_v9 = vsel %vm250_vm12, %v249_v8, %v227_v5 }
 0x1a8   :  { %v253_v10 = vsel %vm252_vm13, %v251_v9, %v243_v7 }
 0x1a9   :  { %371 = vmatmul.msk.f32.vlgmr.msra.gmra.mxu2 %vm312_vm14, %v253_v10 }
 0x22c   :  { %v337_v14 = vpop.f32.mrf.mxu2 }
 0x22d   :  { %v340_v15 = vadd.f32 %v337_v14, %v309_v13 }
 0x22f   :  { %v345_v16 = vadd.f32 %v388_v2, %v340_v15 }
 0x231   :  { %346 = vst.msk [vmem:[#allocation16] sm:$0xff] %vm264_vm9, %v345_v16 }
 0x232   :  { %357 = dma.vmem_to_hbm [thread:$0]  %s353_s12, 128, %s355_s14, [#allocation4]  }
 0x233   :  { %619 = dma.done.wait [#allocation4], 128  }
 0x234   :  { %620 = vsyncadd [#allocation4], 4294967168 }
 0x235   :  { %362 = vsyncpa [#allocation3], 1 }
 0x236   :  { %363 = vsyncpa [#allocation6], 1 }
 0x237   :  { %364 = vsyncpa [#allocation9], 1 }
 0x238   :  { %365 = vsyncpa [#allocation12], 1 }
 0x239   :  { %366 = vsyncpa [#allocation15], 1 }
 0x23a   :  { %367 = vsyncpa [#allocation4], 1 }

</bundles_post_ra>
